<compile_context>
chip_gen: v5e
topology: v5e:2x2
jax: 0.10.0
libtpu: 0.0.40
codegen_flags: <defaults>
</compile_context>

<pallas_src>
import functools

import jax
import jax.numpy as jnp
from jax.experimental import pallas as pl
from jax.experimental.pallas import tpu as pltpu

LANES = 128
_SUB = 8              # output tile (1, 8, 128) obeys the (8, 128) tiling rule
_CHUNK_ROWS = 512     # inner-loop sub-chunk (bounds full-block VMEM temporaries)
_EPS = 1e-8


def _sketch_noise_mask_loss_kernel(pred_ref, target_ref, info_ref, out_ref, *,
                                   threshold_w, total_rows, tile_rows,
                                   chunk_rows):
    i = pl.program_id(0)
    last = pl.num_programs(0) - 1
    n_chunks = tile_rows // chunk_rows          # static
    thr = jnp.float32(threshold_w)
    eps = jnp.float32(_EPS)
    one = jnp.float32(1.0)

    def _load(ref, c):
        if n_chunks == 1:
            return ref[...].astype(jnp.float32)
        r0 = pl.multiple_of(c * chunk_rows, chunk_rows)
        return ref[pl.ds(r0, chunk_rows), :].astype(jnp.float32)

    def _block_sums(masked):
        # masked is a static Python bool: only the last (possibly partial) block
        # pays for the row-validity mask; interior blocks skip ~6-8 VALU ops/elem.
        def body(c, carry):
            a_mw, a_mb, a_mwl, a_mbl = carry      # each (1, 128) f32 per-lane acc
            p = _load(pred_ref, c)
            t = _load(target_ref, c)
            info = _load(info_ref, c)
            if masked:
                row = (i * tile_rows + c * chunk_rows
                       + jax.lax.broadcasted_iota(jnp.int32, p.shape, 0))
                valid = row < total_rows
                # Sanitize out-of-bounds rows before log() so no NaN is produced.
                p = jnp.where(valid, p, jnp.float32(0.5))
                t = jnp.where(valid, t, jnp.float32(0.0))
                m = jnp.where(valid & (info < thr), one, jnp.float32(0.0))
            else:
                m = jnp.where(info < thr, one, jnp.float32(0.0))
            lpp = -(t * jnp.log(p + eps) + (one - t) * jnp.log(one - p + eps))
            m_w = m * t
            m_b = m * (one - t)
            return (a_mw + jnp.sum(m_w, axis=0, keepdims=True),
                    a_mb + jnp.sum(m_b, axis=0, keepdims=True),
                    a_mwl + jnp.sum(m_w * lpp, axis=0, keepdims=True),
                    a_mbl + jnp.sum(m_b * lpp, axis=0, keepdims=True))

        init = tuple(jnp.zeros((1, LANES), jnp.float32) for _ in range(4))
        a_mw, a_mb, a_mwl, a_mbl = jax.lax.fori_loop(0, n_chunks, body, init)
        # One cross-lane reduce per block (XLU), amortized over the whole block.
        return jnp.sum(a_mw), jnp.sum(a_mb), jnp.sum(a_mwl), jnp.sum(a_mbl)

    def _write(sums):
        s_mw, s_mb, s_mwl, s_mbl = sums
        sub = jax.lax.broadcasted_iota(jnp.int32, out_ref.shape, 1)
        out_ref[...] = (jnp.where(sub == 0, s_mw, 0.0)
                        + jnp.where(sub == 1, s_mb, 0.0)
                        + jnp.where(sub == 2, s_mwl, 0.0)
                        + jnp.where(sub == 3, s_mbl, 0.0))

    @pl.when(i < last)
    def _():
        _write(_block_sums(masked=False))

    @pl.when(i == last)
    def _():
        _write(_block_sums(masked=True))


def _partial_sums_jnp(p, t, info, threshold_w):
    """Pure-jnp four partial sums (used for the <128-element tail / tiny inputs)."""
    p = p.astype(jnp.float32)
    t = t.astype(jnp.float32)
    info = info.astype(jnp.float32)
    m = (info < threshold_w).astype(jnp.float32)
    lpp = -(t * jnp.log(p + _EPS) + (1.0 - t) * jnp.log(1.0 - p + _EPS))
    m_w = m * t
    m_b = m * (1.0 - t)
    return jnp.sum(m_w), jnp.sum(m_b), jnp.sum(m_w * lpp), jnp.sum(m_b * lpp)


def sketch_noise_mask_loss(pred, target, infodraw, threshold_w, *,
                           max_tile_rows=4096):
    """Pallas implementation of SketchNoiseMaskLoss.forward. Returns scalar f32."""
    assert pred.shape == target.shape == infodraw.shape
    total = int(pred.size)
    rows = total // LANES                 # bulk rows streamed by the kernel
    bulk = rows * LANES
    tail = total - bulk

    pred_f = jnp.ravel(pred)
    target_f = jnp.ravel(target)
    info_f = jnp.ravel(infodraw)

    if rows == 0:
        # Fewer than 128 elements: no full lane-row to stream; pure jnp.
        s_mw, s_mb, s_mwl, s_mbl = _partial_sums_jnp(
            pred_f, target_f, info_f, threshold_w)
        return s_mwl / s_mw + s_mbl / s_mb

    def _as_rows(x):
        # total % 128 == 0 -> free reshape; otherwise slice off the tail
        # (tail handled in plain jnp below; no full-array jnp.pad copy).
        x = x if tail == 0 else x[:bulk]
        return x.reshape(rows, LANES)

    pred_2d = _as_rows(pred_f)
    target_2d = _as_rows(target_f)
    info_2d = _as_rows(info_f)

    # --- tile selection ------------------------------------------------------
    #  * tile_rows multiple of 8 (sublane tiling) or full-extent when rows < 8
    #  * keep >= 2 grid steps when possible so v7x's two TensorCores both work
    #  * tile_rows a multiple of the inner sub-chunk when it exceeds it
    if rows < 8:
        tile_rows = rows
        chunk_rows = rows
    else:
        want = min(int(max_tile_rows), pl.cdiv(rows, 2))
        if want >= _CHUNK_ROWS:
            tile_rows = ((want + _CHUNK_ROWS - 1) // _CHUNK_ROWS) * _CHUNK_ROWS
            chunk_rows = _CHUNK_ROWS
        else:
            tile_rows = ((want + 7) // 8) * 8
            chunk_rows = tile_rows
    num_blocks = pl.cdiv(rows, tile_rows)

    kernel = functools.partial(
        _sketch_noise_mask_loss_kernel,
        threshold_w=float(threshold_w),
        total_rows=int(rows),
        tile_rows=int(tile_rows),
        chunk_rows=int(chunk_rows),
    )

    in_spec = pl.BlockSpec((tile_rows, LANES), lambda i: (i, 0))
    partials = pl.pallas_call(
        kernel,
        out_shape=jax.ShapeDtypeStruct((num_blocks, _SUB, LANES), jnp.float32),
        grid=(num_blocks,),
        in_specs=[in_spec, in_spec, in_spec],
        out_specs=pl.BlockSpec((1, _SUB, LANES), lambda i: (i, 0, 0)),
        compiler_params=pltpu.CompilerParams(
            dimension_semantics=("parallel",),   # v7x: shard blocks over 2 TCs
            vmem_limit_bytes=32 * 1024 * 1024,   # safe on v5e/v6e/v7x
        ),
    )(pred_2d, target_2d, info_2d)

    # Tiny final reduction + divisions (outside the mem-bound streaming kernel).
    sums = jnp.sum(partials, axis=0)             # (8, 128)
    s_mw, s_mb = sums[0, 0], sums[1, 0]
    s_mwl, s_mbl = sums[2, 0], sums[3, 0]

    if tail:
        t_mw, t_mb, t_mwl, t_mbl = _partial_sums_jnp(
            pred_f[bulk:], target_f[bulk:], info_f[bulk:], threshold_w)
        s_mw = s_mw + t_mw
        s_mb = s_mb + t_mb
        s_mwl = s_mwl + t_mwl
        s_mbl = s_mbl + t_mbl

    return s_mwl / s_mw + s_mbl / s_mb


def _reference_loss(pred, target, infodraw, threshold_w):
    pred = pred.astype(jnp.float32)
    target = target.astype(jnp.float32)
    infodraw = infodraw.astype(jnp.float32)
    mask = (infodraw < threshold_w).astype(jnp.float32)
    lpp = -(target * jnp.log(pred + 1e-8)
            + (1.0 - target) * jnp.log(1.0 - pred + 1e-8))
    m_w = mask * target
    m_b = mask * (1.0 - target)
    return jnp.sum(m_w * lpp) / jnp.sum(m_w) + jnp.sum(m_b * lpp) / jnp.sum(m_b)


if __name__ == "__main__":
    key = jax.random.PRNGKey(0)
    threshold_W = 0.95

    def _make(shape, k):
        k1, k2, k3 = jax.random.split(k, 3)
        pred = jax.nn.sigmoid(jax.random.normal(k1, shape, jnp.float32))
        target = (jax.random.uniform(k2, shape) > 0.5).astype(jnp.float32)
        infodraw = jax.random.uniform(k3, shape, jnp.float32)
        return pred, target, infodraw

    k_a, k_b, k_c = jax.random.split(key, 3)

    cases = [
        ((2, 4, 16, 16), k_a),   # total % 128 == 0: kernel-only path, 2 blocks
        ((2, 3, 17, 19), k_b),   # odd total: partial last block + wrapper tail
        ((1, 1, 5, 9), k_c),     # < 128 elements: pure-jnp fallback
    ]
    for shape, k in cases:
        pred, target, infodraw = _make(shape, k)
        loss = jax.block_until_ready(
            sketch_noise_mask_loss(pred, target, infodraw, threshold_W))
        ref = jax.block_until_ready(
            _reference_loss(pred, target, infodraw, threshold_W))
        if not jnp.allclose(loss, ref, rtol=2e-5, atol=2e-5):
            raise AssertionError(f"mismatch for {shape}: pallas={loss} ref={ref}")

    print("KERNEL_OK")
</pallas_src>

<mosaic_0001>
module attributes {stable_mosaic.version = 11 : i64} {
  func.func @_sketch_noise_mask_loss_kernel(%arg0: i32, %arg1: memref<8x128xf32, #tpu.memory_space<vmem>>, %arg2: memref<8x128xf32, #tpu.memory_space<vmem>>, %arg3: memref<8x128xf32, #tpu.memory_space<vmem>>, %arg4: memref<1x8x128xf32, #tpu.memory_space<vmem>>) attributes {dimension_semantics = [#tpu.dimension_semantics<parallel>], iteration_bounds = array<i64: 2>, scalar_prefetch = 0 : i64, scratch_operands = 0 : i64, tpu.core_type = #tpu.core_type<tc>, window_params = [{transform_indices = @transform_0, window_bounds = array<i64: 8, 128>}, {transform_indices = @transform_1, window_bounds = array<i64: 8, 128>}, {transform_indices = @transform_2, window_bounds = array<i64: 8, 128>}, {transform_indices = @transform_3, window_bounds = array<i64: 1, 8, 128>}]} {
    %c1_i32 = arith.constant 1 : i32
    %0 = arith.cmpi slt, %arg0, %c1_i32 : i32
    %1 = arith.extui %0 : i1 to i32
    %cst = arith.constant 0.949999988 : f32
    %cst_0 = arith.constant 1.000000e+00 : f32
    %cst_1 = arith.constant 9.99999993E-9 : f32
    %c0_i32 = arith.constant 0 : i32
    %2 = arith.cmpi ne, %1, %c0_i32 : i32
    scf.if %2 {
      %cst_7 = arith.constant 0.000000e+00 : f32
      %6 = vector.broadcast %cst_7 : f32 to vector<1x128xf32>
      %cst_8 = arith.constant 0.000000e+00 : f32
      %7 = vector.broadcast %cst_8 : f32 to vector<1x128xf32>
      %cst_9 = arith.constant 0.000000e+00 : f32
      %8 = vector.broadcast %cst_9 : f32 to vector<1x128xf32>
      %cst_10 = arith.constant 0.000000e+00 : f32
      %9 = vector.broadcast %cst_10 : f32 to vector<1x128xf32>
      %c0_i32_11 = arith.constant 0 : i32
      %c0 = arith.constant 0 : index
      %c0_12 = arith.constant 0 : index
      %10 = vector.load %arg1[%c0, %c0_12] : memref<8x128xf32, #tpu.memory_space<vmem>>, vector<8x128xf32>
      %c0_13 = arith.constant 0 : index
      %c0_14 = arith.constant 0 : index
      %11 = vector.load %arg2[%c0_13, %c0_14] : memref<8x128xf32, #tpu.memory_space<vmem>>, vector<8x128xf32>
      %c0_15 = arith.constant 0 : index
      %c0_16 = arith.constant 0 : index
      %12 = vector.load %arg3[%c0_15, %c0_16] : memref<8x128xf32, #tpu.memory_space<vmem>>, vector<8x128xf32>
      %13 = vector.broadcast %cst : f32 to vector<8x128xf32>
      %14 = arith.cmpf olt, %12, %13 : vector<8x128xf32>
      %cst_17 = arith.constant 0.000000e+00 : f32
      %15 = vector.broadcast %cst_0 : f32 to vector<8x128xf32>
      %16 = vector.broadcast %cst_17 : f32 to vector<8x128xf32>
      %17 = arith.select %14, %15, %16 : vector<8x128xi1>, vector<8x128xf32>
      %18 = vector.broadcast %cst_1 : f32 to vector<8x128xf32>
      %19 = arith.addf %10, %18 : vector<8x128xf32>
      %20 = math.log %19 : vector<8x128xf32>
      %21 = arith.mulf %11, %20 : vector<8x128xf32>
      %22 = vector.broadcast %cst_0 : f32 to vector<8x128xf32>
      %23 = arith.subf %22, %11 : vector<8x128xf32>
      %24 = vector.broadcast %cst_0 : f32 to vector<8x128xf32>
      %25 = arith.subf %24, %10 : vector<8x128xf32>
      %26 = vector.broadcast %cst_1 : f32 to vector<8x128xf32>
      %27 = arith.addf %25, %26 : vector<8x128xf32>
      %28 = math.log %27 : vector<8x128xf32>
      %29 = arith.mulf %23, %28 : vector<8x128xf32>
      %30 = arith.addf %21, %29 : vector<8x128xf32>
      %cst_18 = arith.constant 0.000000e+00 : f32
      %31 = vector.broadcast %cst_18 : f32 to vector<8x128xf32>
      %32 = arith.subf %31, %30 : vector<8x128xf32>
      %33 = arith.mulf %17, %11 : vector<8x128xf32>
      %34 = vector.broadcast %cst_0 : f32 to vector<8x128xf32>
      %35 = arith.subf %34, %11 : vector<8x128xf32>
      %36 = arith.mulf %17, %35 : vector<8x128xf32>
      %cst_19 = arith.constant dense<0.000000e+00> : vector<128xf32>
      %37 = vector.multi_reduction <add>, %33, %cst_19 [0] : vector<8x128xf32> to vector<128xf32>
      %38 = vector.shape_cast %37 : vector<128xf32> to vector<1x128xf32>
      %39 = arith.addf %6, %38 : vector<1x128xf32>
      %cst_20 = arith.constant dense<0.000000e+00> : vector<128xf32>
      %40 = vector.multi_reduction <add>, %36, %cst_20 [0] : vector<8x128xf32> to vector<128xf32>
      %41 = vector.shape_cast %40 : vector<128xf32> to vector<1x128xf32>
      %42 = arith.addf %7, %41 : vector<1x128xf32>
      %43 = arith.mulf %33, %32 : vector<8x128xf32>
      %cst_21 = arith.constant dense<0.000000e+00> : vector<128xf32>
      %44 = vector.multi_reduction <add>, %43, %cst_21 [0] : vector<8x128xf32> to vector<128xf32>
      %45 = vector.shape_cast %44 : vector<128xf32> to vector<1x128xf32>
      %46 = arith.addf %8, %45 : vector<1x128xf32>
      %47 = arith.mulf %36, %32 : vector<8x128xf32>
      %cst_22 = arith.constant dense<0.000000e+00> : vector<128xf32>
      %48 = vector.multi_reduction <add>, %47, %cst_22 [0] : vector<8x128xf32> to vector<128xf32>
      %49 = vector.shape_cast %48 : vector<128xf32> to vector<1x128xf32>
      %50 = arith.addf %9, %49 : vector<1x128xf32>
      %51 = vector.shape_cast %39 : vector<1x128xf32> to vector<1x1x128xf32>
      %cst_23 = arith.constant dense<0.000000e+00> : vector<1xf32>
      %52 = vector.multi_reduction <add>, %51, %cst_23 [1, 2] : vector<1x1x128xf32> to vector<1xf32>
      %53 = vector.shape_cast %52 : vector<1xf32> to vector<1x1x1xf32>
      %54 = vector.extract %53[0, 0, 0] : f32 from vector<1x1x1xf32>
      %55 = vector.shape_cast %42 : vector<1x128xf32> to vector<1x1x128xf32>
      %cst_24 = arith.constant dense<0.000000e+00> : vector<1xf32>
      %56 = vector.multi_reduction <add>, %55, %cst_24 [1, 2] : vector<1x1x128xf32> to vector<1xf32>
      %57 = vector.shape_cast %56 : vector<1xf32> to vector<1x1x1xf32>
      %58 = vector.extract %57[0, 0, 0] : f32 from vector<1x1x1xf32>
      %59 = vector.shape_cast %46 : vector<1x128xf32> to vector<1x1x128xf32>
      %cst_25 = arith.constant dense<0.000000e+00> : vector<1xf32>
      %60 = vector.multi_reduction <add>, %59, %cst_25 [1, 2] : vector<1x1x128xf32> to vector<1xf32>
      %61 = vector.shape_cast %60 : vector<1xf32> to vector<1x1x1xf32>
      %62 = vector.extract %61[0, 0, 0] : f32 from vector<1x1x1xf32>
      %63 = vector.shape_cast %50 : vector<1x128xf32> to vector<1x1x128xf32>
      %cst_26 = arith.constant dense<0.000000e+00> : vector<1xf32>
      %64 = vector.multi_reduction <add>, %63, %cst_26 [1, 2] : vector<1x1x128xf32> to vector<1xf32>
      %65 = vector.shape_cast %64 : vector<1xf32> to vector<1x1x1xf32>
      %66 = vector.extract %65[0, 0, 0] : f32 from vector<1x1x1xf32>
      %67 = tpu.iota {dimensions = array<i32: 1>} : vector<1x8x128xi32>
      %c0_i32_27 = arith.constant 0 : i32
      %68 = vector.broadcast %c0_i32_27 : i32 to vector<1x8x128xi32>
      %69 = arith.cmpi eq, %67, %68 : vector<1x8x128xi32>
      %cst_28 = arith.constant 0.000000e+00 : f32
      %70 = vector.broadcast %54 : f32 to vector<1x8x128xf32>
      %71 = vector.broadcast %cst_28 : f32 to vector<1x8x128xf32>
      %72 = arith.select %69, %70, %71 : vector<1x8x128xi1>, vector<1x8x128xf32>
      %c1_i32_29 = arith.constant 1 : i32
      %73 = vector.broadcast %c1_i32_29 : i32 to vector<1x8x128xi32>
      %74 = arith.cmpi eq, %67, %73 : vector<1x8x128xi32>
      %cst_30 = arith.constant 0.000000e+00 : f32
      %75 = vector.broadcast %58 : f32 to vector<1x8x128xf32>
      %76 = vector.broadcast %cst_30 : f32 to vector<1x8x128xf32>
      %77 = arith.select %74, %75, %76 : vector<1x8x128xi1>, vector<1x8x128xf32>
      %78 = arith.addf %72, %77 : vector<1x8x128xf32>
      %c2_i32 = arith.constant 2 : i32
      %79 = vector.broadcast %c2_i32 : i32 to vector<1x8x128xi32>
      %80 = arith.cmpi eq, %67, %79 : vector<1x8x128xi32>
      %cst_31 = arith.constant 0.000000e+00 : f32
      %81 = vector.broadcast %62 : f32 to vector<1x8x128xf32>
      %82 = vector.broadcast %cst_31 : f32 to vector<1x8x128xf32>
      %83 = arith.select %80, %81, %82 : vector<1x8x128xi1>, vector<1x8x128xf32>
      %84 = arith.addf %78, %83 : vector<1x8x128xf32>
      %c3_i32 = arith.constant 3 : i32
      %85 = vector.broadcast %c3_i32 : i32 to vector<1x8x128xi32>
      %86 = arith.cmpi eq, %67, %85 : vector<1x8x128xi32>
      %cst_32 = arith.constant 0.000000e+00 : f32
      %87 = vector.broadcast %66 : f32 to vector<1x8x128xf32>
      %88 = vector.broadcast %cst_32 : f32 to vector<1x8x128xf32>
      %89 = arith.select %86, %87, %88 : vector<1x8x128xi1>, vector<1x8x128xf32>
      %90 = arith.addf %84, %89 : vector<1x8x128xf32>
      %c0_33 = arith.constant 0 : index
      %c0_34 = arith.constant 0 : index
      %c0_35 = arith.constant 0 : index
      %91 = vector.load %arg4[%c0_33, %c0_34, %c0_35] : memref<1x8x128xf32, #tpu.memory_space<vmem>>, vector<1x8x128xf32>
      tpu.vector_store %arg4[%c0_33, %c0_34, %c0_35], %90 {strides = array<i32>} : memref<1x8x128xf32, #tpu.memory_space<vmem>>, vector<1x8x128xf32>,
    } else {
    }
    %c1_i32_2 = arith.constant 1 : i32
    %3 = arith.cmpi eq, %arg0, %c1_i32_2 : i32
    %4 = arith.extui %3 : i1 to i32
    %cst_3 = arith.constant 0.949999988 : f32
    %cst_4 = arith.constant 1.000000e+00 : f32
    %cst_5 = arith.constant 9.99999993E-9 : f32
    %c0_i32_6 = arith.constant 0 : i32
    %5 = arith.cmpi ne, %4, %c0_i32_6 : i32
    scf.if %5 {
      %cst_7 = arith.constant 0.000000e+00 : f32
      %6 = vector.broadcast %cst_7 : f32 to vector<1x128xf32>
      %cst_8 = arith.constant 0.000000e+00 : f32
      %7 = vector.broadcast %cst_8 : f32 to vector<1x128xf32>
      %cst_9 = arith.constant 0.000000e+00 : f32
      %8 = vector.broadcast %cst_9 : f32 to vector<1x128xf32>
      %cst_10 = arith.constant 0.000000e+00 : f32
      %9 = vector.broadcast %cst_10 : f32 to vector<1x128xf32>
      %c0_i32_11 = arith.constant 0 : i32
      %c0 = arith.constant 0 : index
      %c0_12 = arith.constant 0 : index
      %10 = vector.load %arg1[%c0, %c0_12] : memref<8x128xf32, #tpu.memory_space<vmem>>, vector<8x128xf32>
      %c0_13 = arith.constant 0 : index
      %c0_14 = arith.constant 0 : index
      %11 = vector.load %arg2[%c0_13, %c0_14] : memref<8x128xf32, #tpu.memory_space<vmem>>, vector<8x128xf32>
      %c0_15 = arith.constant 0 : index
      %c0_16 = arith.constant 0 : index
      %12 = vector.load %arg3[%c0_15, %c0_16] : memref<8x128xf32, #tpu.memory_space<vmem>>, vector<8x128xf32>
      %c8_i32 = arith.constant 8 : i32
      %13 = arith.muli %arg0, %c8_i32 : i32
      %c8_i32_17 = arith.constant 8 : i32
      %14 = arith.muli %c0_i32_11, %c8_i32_17 : i32
      %15 = arith.addi %13, %14 : i32
      %16 = tpu.iota {dimensions = array<i32: 0>} : vector<8x128xi32>
      %17 = vector.broadcast %15 : i32 to vector<8x128xi32>
      %18 = arith.addi %17, %16 : vector<8x128xi32>
      %c16_i32 = arith.constant 16 : i32
      %19 = vector.broadcast %c16_i32 : i32 to vector<8x128xi32>
      %20 = arith.cmpi slt, %18, %19 : vector<8x128xi32>
      %cst_18 = arith.constant 5.000000e-01 : f32
      %21 = vector.broadcast %cst_18 : f32 to vector<8x128xf32>
      %22 = arith.select %20, %10, %21 : vector<8x128xi1>, vector<8x128xf32>
      %cst_19 = arith.constant 0.000000e+00 : f32
      %23 = vector.broadcast %cst_19 : f32 to vector<8x128xf32>
      %24 = arith.select %20, %11, %23 : vector<8x128xi1>, vector<8x128xf32>
      %25 = vector.broadcast %cst_3 : f32 to vector<8x128xf32>
      %26 = arith.cmpf olt, %12, %25 : vector<8x128xf32>
      %27 = arith.andi %20, %26 : vector<8x128xi1>
      %cst_20 = arith.constant 0.000000e+00 : f32
      %28 = vector.broadcast %cst_4 : f32 to vector<8x128xf32>
      %29 = vector.broadcast %cst_20 : f32 to vector<8x128xf32>
      %30 = arith.select %27, %28, %29 : vector<8x128xi1>, vector<8x128xf32>
      %31 = vector.broadcast %cst_5 : f32 to vector<8x128xf32>
      %32 = arith.addf %22, %31 : vector<8x128xf32>
      %33 = math.log %32 : vector<8x128xf32>
      %34 = arith.mulf %24, %33 : vector<8x128xf32>
      %35 = vector.broadcast %cst_4 : f32 to vector<8x128xf32>
      %36 = arith.subf %35, %24 : vector<8x128xf32>
      %37 = vector.broadcast %cst_4 : f32 to vector<8x128xf32>
      %38 = arith.subf %37, %22 : vector<8x128xf32>
      %39 = vector.broadcast %cst_5 : f32 to vector<8x128xf32>
      %40 = arith.addf %38, %39 : vector<8x128xf32>
      %41 = math.log %40 : vector<8x128xf32>
      %42 = arith.mulf %36, %41 : vector<8x128xf32>
      %43 = arith.addf %34, %42 : vector<8x128xf32>
      %cst_21 = arith.constant 0.000000e+00 : f32
      %44 = vector.broadcast %cst_21 : f32 to vector<8x128xf32>
      %45 = arith.subf %44, %43 : vector<8x128xf32>
      %46 = arith.mulf %30, %24 : vector<8x128xf32>
      %47 = vector.broadcast %cst_4 : f32 to vector<8x128xf32>
      %48 = arith.subf %47, %24 : vector<8x128xf32>
      %49 = arith.mulf %30, %48 : vector<8x128xf32>
      %cst_22 = arith.constant dense<0.000000e+00> : vector<128xf32>
      %50 = vector.multi_reduction <add>, %46, %cst_22 [0] : vector<8x128xf32> to vector<128xf32>
      %51 = vector.shape_cast %50 : vector<128xf32> to vector<1x128xf32>
      %52 = arith.addf %6, %51 : vector<1x128xf32>
      %cst_23 = arith.constant dense<0.000000e+00> : vector<128xf32>
      %53 = vector.multi_reduction <add>, %49, %cst_23 [0] : vector<8x128xf32> to vector<128xf32>
      %54 = vector.shape_cast %53 : vector<128xf32> to vector<1x128xf32>
      %55 = arith.addf %7, %54 : vector<1x128xf32>
      %56 = arith.mulf %46, %45 : vector<8x128xf32>
      %cst_24 = arith.constant dense<0.000000e+00> : vector<128xf32>
      %57 = vector.multi_reduction <add>, %56, %cst_24 [0] : vector<8x128xf32> to vector<128xf32>
      %58 = vector.shape_cast %57 : vector<128xf32> to vector<1x128xf32>
      %59 = arith.addf %8, %58 : vector<1x128xf32>
      %60 = arith.mulf %49, %45 : vector<8x128xf32>
      %cst_25 = arith.constant dense<0.000000e+00> : vector<128xf32>
      %61 = vector.multi_reduction <add>, %60, %cst_25 [0] : vector<8x128xf32> to vector<128xf32>
      %62 = vector.shape_cast %61 : vector<128xf32> to vector<1x128xf32>
      %63 = arith.addf %9, %62 : vector<1x128xf32>
      %c1_i32_26 = arith.constant 1 : i32
      %64 = vector.shape_cast %52 : vector<1x128xf32> to vector<1x1x128xf32>
      %cst_27 = arith.constant dense<0.000000e+00> : vector<1xf32>
      %65 = vector.multi_reduction <add>, %64, %cst_27 [1, 2] : vector<1x1x128xf32> to vector<1xf32>
      %66 = vector.shape_cast %65 : vector<1xf32> to vector<1x1x1xf32>
      %67 = vector.extract %66[0, 0, 0] : f32 from vector<1x1x1xf32>
      %68 = vector.shape_cast %55 : vector<1x128xf32> to vector<1x1x128xf32>
      %cst_28 = arith.constant dense<0.000000e+00> : vector<1xf32>
      %69 = vector.multi_reduction <add>, %68, %cst_28 [1, 2] : vector<1x1x128xf32> to vector<1xf32>
      %70 = vector.shape_cast %69 : vector<1xf32> to vector<1x1x1xf32>
      %71 = vector.extract %70[0, 0, 0] : f32 from vector<1x1x1xf32>
      %72 = vector.shape_cast %59 : vector<1x128xf32> to vector<1x1x128xf32>
      %cst_29 = arith.constant dense<0.000000e+00> : vector<1xf32>
      %73 = vector.multi_reduction <add>, %72, %cst_29 [1, 2] : vector<1x1x128xf32> to vector<1xf32>
      %74 = vector.shape_cast %73 : vector<1xf32> to vector<1x1x1xf32>
      %75 = vector.extract %74[0, 0, 0] : f32 from vector<1x1x1xf32>
      %76 = vector.shape_cast %63 : vector<1x128xf32> to vector<1x1x128xf32>
      %cst_30 = arith.constant dense<0.000000e+00> : vector<1xf32>
      %77 = vector.multi_reduction <add>, %76, %cst_30 [1, 2] : vector<1x1x128xf32> to vector<1xf32>
      %78 = vector.shape_cast %77 : vector<1xf32> to vector<1x1x1xf32>
      %79 = vector.extract %78[0, 0, 0] : f32 from vector<1x1x1xf32>
      %80 = tpu.iota {dimensions = array<i32: 1>} : vector<1x8x128xi32>
      %c0_i32_31 = arith.constant 0 : i32
      %81 = vector.broadcast %c0_i32_31 : i32 to vector<1x8x128xi32>
      %82 = arith.cmpi eq, %80, %81 : vector<1x8x128xi32>
      %cst_32 = arith.constant 0.000000e+00 : f32
      %83 = vector.broadcast %67 : f32 to vector<1x8x128xf32>
      %84 = vector.broadcast %cst_32 : f32 to vector<1x8x128xf32>
      %85 = arith.select %82, %83, %84 : vector<1x8x128xi1>, vector<1x8x128xf32>
      %c1_i32_33 = arith.constant 1 : i32
      %86 = vector.broadcast %c1_i32_33 : i32 to vector<1x8x128xi32>
      %87 = arith.cmpi eq, %80, %86 : vector<1x8x128xi32>
      %cst_34 = arith.constant 0.000000e+00 : f32
      %88 = vector.broadcast %71 : f32 to vector<1x8x128xf32>
      %89 = vector.broadcast %cst_34 : f32 to vector<1x8x128xf32>
      %90 = arith.select %87, %88, %89 : vector<1x8x128xi1>, vector<1x8x128xf32>
      %91 = arith.addf %85, %90 : vector<1x8x128xf32>
      %c2_i32 = arith.constant 2 : i32
      %92 = vector.broadcast %c2_i32 : i32 to vector<1x8x128xi32>
      %93 = arith.cmpi eq, %80, %92 : vector<1x8x128xi32>
      %cst_35 = arith.constant 0.000000e+00 : f32
      %94 = vector.broadcast %75 : f32 to vector<1x8x128xf32>
      %95 = vector.broadcast %cst_35 : f32 to vector<1x8x128xf32>
      %96 = arith.select %93, %94, %95 : vector<1x8x128xi1>, vector<1x8x128xf32>
      %97 = arith.addf %91, %96 : vector<1x8x128xf32>
      %c3_i32 = arith.constant 3 : i32
      %98 = vector.broadcast %c3_i32 : i32 to vector<1x8x128xi32>
      %99 = arith.cmpi eq, %80, %98 : vector<1x8x128xi32>
      %cst_36 = arith.constant 0.000000e+00 : f32
      %100 = vector.broadcast %79 : f32 to vector<1x8x128xf32>
      %101 = vector.broadcast %cst_36 : f32 to vector<1x8x128xf32>
      %102 = arith.select %99, %100, %101 : vector<1x8x128xi1>, vector<1x8x128xf32>
      %103 = arith.addf %97, %102 : vector<1x8x128xf32>
      %c0_37 = arith.constant 0 : index
      %c0_38 = arith.constant 0 : index
      %c0_39 = arith.constant 0 : index
      %104 = vector.load %arg4[%c0_37, %c0_38, %c0_39] : memref<1x8x128xf32, #tpu.memory_space<vmem>>, vector<1x8x128xf32>
      tpu.vector_store %arg4[%c0_37, %c0_38, %c0_39], %103 {strides = array<i32>} : memref<1x8x128xf32, #tpu.memory_space<vmem>>, vector<1x8x128xf32>,
    } else {
    }
    return
  }
  func.func @transform_0(%arg0: i32) -> (i32, i32) {
    %c0_i32 = arith.constant 0 : i32
    %c0_i32_0 = arith.constant 0 : i32
    return %arg0, %c0_i32 : i32, i32
  }
  func.func @transform_1(%arg0: i32) -> (i32, i32) {
    %c0_i32 = arith.constant 0 : i32
    %c0_i32_0 = arith.constant 0 : i32
    return %arg0, %c0_i32 : i32, i32
  }
  func.func @transform_2(%arg0: i32) -> (i32, i32) {
    %c0_i32 = arith.constant 0 : i32
    %c0_i32_0 = arith.constant 0 : i32
    return %arg0, %c0_i32 : i32, i32
  }
  func.func @transform_3(%arg0: i32) -> (i32, i32, i32) {
    %c0_i32 = arith.constant 0 : i32
    %c0_i32_0 = arith.constant 0 : i32
    %c0_i32_1 = arith.constant 0 : i32
    return %arg0, %c0_i32, %c0_i32_0 : i32, i32, i32
  }
}

</mosaic_0001>

<bundles_post_ra>
// kernel: tpu_custom_call.1
= control target key start
LH: loop header
LB: loop body
LE: loop exit
PB: predicated region body
PF: predicated region fallthrough
CT: control target
= control target key end

     0   :  { %s1131_s0 = inlined_call_operand.hbm [shape: f32[16,128], index: 0, kind: input, shape index: {}]   ;;  %s1132_s1 = inlined_call_operand.hbm [shape: f32[16,128], index: 1, kind: input, shape index: {}]   ;;  %s1133_s2 = inlined_call_operand.hbm [shape: f32[16,128], index: 2, kind: input, shape index: {}]   ;;  %s1134_s3 = inlined_call_operand.hbm [shape: f32[2,8,128], index: 3, kind: output, shape index: {}]  }
   0x1   :  { %1135 = sst [smem:[#allocation13_spill]] %s1132_s1 }
   0x2   :  { %8 = vsyncpa [#allocation3], 0 }
   0x3   :  { %10 = vsyncpa [#allocation3 + $0x1], 0 }
   0x4   :  { %11 = vsyncpa [#allocation6], 0 }
   0x5   :  { %13 = vsyncpa [#allocation6 + $0x1], 0 }
   0x6   :  { %14 = vsyncpa [#allocation4], 0 }
   0x7   :  { %16 = vsyncpa [#allocation4 + $0x1], 0  ;;  %s910_s12 = smov 0   ;;  %s912_s13 = smov 0  }
   0x8   :  { %s914_s14 = smov 0   ;;  %s916_s15 = smov 0  }
   0x9 LB: > { %s931_s16 = sadd.s32 4294967295, %s886_s15   ;;  %s623_s17 = sadd.s32 4294967294, %s886_s15   ;;  %s886_s15 = sphi %s916_s15, %s1147_s15   ;;  %s882_s14 = sphi %s914_s14, %s1146_s14   ;;  %s878_s13 = sphi %s912_s13, %s1145_s13   ;;  %s874_s12 = sphi %s910_s12, %s1144_s12  }
   0xa   : > { %s935_s18 = sadd.s32 1, %s886_s15   ;;  %s29_s19 = sadd.s32 1, %s882_s14 }
   0xb   : > { %s26_s20 = ssub.s32 %s886_s15, %s935_s18  ;;  %p36_p0 = scmp.ne.s32.totalorder %s882_s14, %s878_s13 }
   0xc   : > { %p27_p1 = scmp.eq.s32.totalorder %s26_s20, 0  ;;  %p37_p2 = scmp.eq.s32.totalorder %s886_s15, 0 }
   0xd   : > { %p42_p3 = scmp.ne.s32.totalorder %s878_s13, %s874_s12  ;;  %p43_p4 = scmp.eq.s32.totalorder %s931_s16, 0 }
   0xe   : > { %s947_s21 = scalar_select %p27_p1, %s882_s14, %s29_s19  }
   0xf   : > { %p38_p5 = por %p37_p2, %p36_p0  ;;  %p949_p6 = por %p43_p4, %p42_p3 }
  0x10   : > { %1136 = sst [smem:[#allocation12_spill]] %s947_s21  ;;  %p118_p7 = scmp.eq.s32.totalorder %s931_s16, 1 }
  0x11   : > { %p124_p8 = scmp.eq.s32.totalorder %s623_s17, 1  ;;  %p625_p9 = scmp.ge.s32.totalorder %s886_s15, 2 }
  0x12   : > { %p682_p10 = scmp.lt.s32.totalorder %s886_s15, 2  ;;  %p956_p11 = por %p118_p7, %p36_p0 }
  0x13   : > { %p960_p12 = por %p124_p8, %p42_p3  ;;  %s144_s25 = sand.u32 1, %s882_s14  }
  0x14   : > { %s966_s26 = sshll.u32 %s886_s15, 3  ;;  %s970_s27 = sshll.u32 %s144_s25, 3 }
  0x15   : > { %p972_p13 = pnand %p682_p10, %p38_p5  ;;  %s163_s29 = sand.u32 1, %s886_s15  }
  0x16   : > { %s1141_s1 = sld [smem:[#allocation13_spill]]  ;;  %s167_s6 = scalar_lea.vmem [#allocation5], %s970_s27 }
  0x17   : > { %s175_s7 = sshll.u32 %s167_s6, 4  ;;  %p632_p0 = scmp.ge.s32.totalorder %s886_s15, 1  ;;  %s176_s7 = int_to_ptr.vmem [resolvable:$true] %s175_s7 }
  0x18   : > { %s983_s9 = scalar_lea.sflag [#allocation6], %s163_s29  ;;  %p730_p2 = pneg %p972_p13 }
  0x1c   : > { %s171_s5 = scalar_lea.hbm %s1141_s1, %s966_s26  ;;  %s733_s20 = scalar_lea.hbm %s1141_s1, 16 }
  0x1d   : > { %s173_s8 = sshll.u32 %s171_s5, 4  ;;  %s174_s8 = int_to_ptr.hbm [resolvable:$true] %s173_s8 }
  0x1e   : > { %s726_s10 = sshra.s32 %s174_s8, 4  ;;  %s727_s10 = int_to_ptr.hbm [resolvable:$true] %s726_s10 }
  0x1f   : > { %s728_s11 = scalar_lea.hbm %s727_s10, 8  ;;  %p734_p5 = scmp.lt.s32.totalorder %s727_s10, %s1141_s1 }
  0x20   : > { %p729_p1 = scmp.ne.s32.totalorder %s727_s10, %s728_s11  ;;  %p735_p7 = scmp.lt.s32.totalorder %s733_s20, %s728_s11 }
  0x22   : > { %p731_p3 = pnand %p730_p2, %p729_p1  ;;  %p736_p8 = por %p735_p7, %p734_p5 }
  0x24   : > { %p732_p4 = pneg %p731_p3 }
  0x26   : > { %p737_p10 = pnand %p736_p8, %p732_p4 }
  0x28   : > { %740 = shalt.err (!%p737_p10)
}
  0x29   : > { %674 = dma.hbm_to_vmem [thread:$0]  (!%p972_p13), %s174_s8, 128, %s176_s7, %s983_s9  }
  0x2a   : > { %p199_p1 = scmp.lt.s32.totalorder %s886_s15, 3  ;;  %s152_s6 = scalar_lea.hbm %s1131_s0, %s966_s26 }
  0x2b   : > { %s154_s11 = sshll.u32 %s152_s6, 4  ;;  %s148_s17 = scalar_lea.vmem [#allocation2], %s970_s27  ;;  %s155_s11 = int_to_ptr.hbm [resolvable:$true] %s154_s11 }
  0x2c   : > { %p1006_p3 = pnand %p632_p0, %p199_p1  ;;  %s156_s19 = sshll.u32 %s148_s17, 4  ;;  %s157_s19 = int_to_ptr.vmem [resolvable:$true] %s156_s19 }
  0x2d   : > { %s145_s20 = scalar_lea.sflag [#allocation3], %s144_s25  ;;  %s756_s30 = sshra.s32 %s155_s11, 4  ;;  %s757_s30 = int_to_ptr.hbm [resolvable:$true] %s756_s30 }
  0x2e   : > { %s758_s7 = scalar_lea.hbm %s757_s30, 8  ;;  %s763_s29 = scalar_lea.hbm %s1131_s0, 16 }
  0x2f   : > { %p759_p4 = scmp.ne.s32.totalorder %s757_s30, %s758_s7  ;;  %p764_p0 = scmp.lt.s32.totalorder %s757_s30, %s1131_s0 }
  0x30   : > { %p765_p8 = scmp.lt.s32.totalorder %s763_s29, %s758_s7 }
  0x31   : > { %p761_p5 = pnand %p759_p4, %p730_p2 }
  0x32   : > { %p766_p10 = por %p765_p8, %p764_p0 }
  0x33   : > { %p762_p7 = pneg %p761_p5 }
  0x35   : > { %p767_p1 = pnand %p766_p10, %p762_p7 }
  0x37   : > { %770 = shalt.err (!%p767_p1)
}
  0x38   : > { %671 = dma.hbm_to_vmem [thread:$0]  (!%p972_p13), %s155_s11, 128, %s157_s19, %s145_s20  }
  0x39   : > { %s190_s1 = scalar_lea.hbm %s1133_s2, %s966_s26  ;;  %s186_s8 = scalar_lea.vmem [#allocation7], %s970_s27 }
  0x3a   : > { %s194_s4 = sshll.u32 %s186_s8, 4  ;;  %s192_s21 = sshll.u32 %s190_s1, 4  ;;  %s195_s4 = int_to_ptr.vmem [resolvable:$true] %s194_s4  ;;  %s193_s21 = int_to_ptr.hbm [resolvable:$true] %s192_s21 }
  0x3b   : > { %s786_s30 = sshra.s32 %s193_s21, 4  ;;  %s793_s11 = scalar_lea.hbm %s1133_s2, 16  ;;  %s787_s30 = int_to_ptr.hbm [resolvable:$true] %s786_s30 }
  0x3c   : > { %s788_s7 = scalar_lea.hbm %s787_s30, 8  ;;  %p794_p0 = scmp.lt.s32.totalorder %s787_s30, %s1133_s2 }
  0x3d   : > { %p789_p4 = scmp.ne.s32.totalorder %s787_s30, %s788_s7  ;;  %p795_p8 = scmp.lt.s32.totalorder %s793_s11, %s788_s7 }
  0x3f   : > { %p791_p5 = pnand %p789_p4, %p730_p2  ;;  %p796_p10 = por %p795_p8, %p794_p0 }
  0x41   : > { %p792_p7 = pneg %p791_p5 }
  0x43   : > { %p797_p1 = pnand %p796_p10, %p792_p7 }
  0x45   : > { %800 = shalt.err (!%p797_p1)
}
  0x46   : > { %677 = dma.hbm_to_vmem [thread:$0]  (!%p972_p13), %s193_s21, 128, %s195_s4, %s983_s9  }
  0x47   : > { %203 = sbr.rel (%p1006_p3) target bundleno = 570 (0x23a), region = 32  ;;  %s1044_s1 = sand.u32 (!%p1006_p3), 1, %s878_s13  }
  0x48   : > { %s1047_s26 = sshll.u32 (!%p1006_p3), %s1044_s1, 3  ;;  %s206_s27 = scalar_lea.sflag (!%p1006_p3), [#allocation3], %s1044_s1 }
  0x49   : > { %s209_s6 = scalar_lea.vmem (!%p1006_p3), [#allocation2], %s1047_s26 }
  0x4c   : > { %861 = dma.done.wait (%p949_p6), %s206_s27, 128  }
  0x4d   : > { %863 = vsyncadd (%p949_p6), %s206_s27, 4294967168  ;;  %s215_s21 = sand.u32 1, %s931_s16   ;;  %s219_s9 = scalar_lea.vmem [#allocation5], %s1047_s26 }
  0x4e   : > { %s216_s28 = scalar_lea.sflag [#allocation6], %s215_s21 }
  0x4f   : > { %865 = dma.done.wait (%p949_p6), %s216_s28, 256  }
  0x50   : > { %867 = vsyncadd (%p949_p6), %s216_s28, 4294967040  ;;  %s229_s10 = scalar_lea.vmem [#allocation7], %s1047_s26  ;;  %s1063_s25 = scalar_lea.vmem [#allocation8], %s1047_s26 }
  0x51   : > { %p637_p13 = scmp.ge.s32.totalorder %s931_s16, 1 }
  0x53   : > { %266 = sbr.rel (%p637_p13) target bundleno = 315 (0x13b), region = 48 }
  0x58   : > { %v268_v0 = vld [vmem:[%s219_s9] sm:$0xff]  ;;  %v269_v1 = vld [vmem:[%s229_s10] sm:$0xff]  ;;  %v888_v6 = vmov 0.0   ;;  %vm316_vm1 = vcmask 1040384  }
  0x59   : > { %v267_v2 = vld [vmem:[%s209_s6] sm:$0xff]  ;;  %vm270_vm0 = vcmp.lt.f32.partialorder %v269_v1, 0.95  ;;  %v276_v3 = vsub.f32 1.0, %v268_v0 }
  0x5a   : > { %v272_v4 = vadd.f32 1e-08, %v267_v2  ;;  %v277_v5 = vsub.f32 1.0, %v267_v2  ;;  %v271_v7 = vsel %vm270_vm0, 1.0, %v888_v6 }
  0x5b   : > { %v284_v8 = vmul.f32 %v271_v7, %v268_v0  ;;  %v285_v9 = vmul.f32 %v276_v3, %v271_v7 }
  0x5c   : > { %718 = vlog2.f32 %v272_v4  ;;  %v278_v10 = vadd.f32 1e-08, %v277_v5 }
  0x5d   : > { %v286_v11 = vrot.slane %v284_v8, 4  ;;  %v293_v12 = vrot.slane %v285_v9, 4 }
  0x5e   : > { %720 = vlog2.f32 %v278_v10 }
  0x5f   : > { %v287_v13 = vadd.f32 %v286_v11, %v284_v8  ;;  %v294_v14 = vadd.f32 %v293_v12, %v285_v9 }
  0x61   : > { %v288_v16 = vrot.slane %v287_v13, 2  ;;  %v295_v17 = vrot.slane %v294_v14, 2 }
  0x62   : > { %v719_v15 = vpop.eup %718 }
  0x63   : > { %v274_v18 = vmul.f32 0.6931472, %v719_v15  ;;  %v289_v20 = vadd.f32 %v288_v16, %v287_v13  ;;  %v296_v21 = vadd.f32 %v295_v17, %v294_v14  ;;  %v357_v13 = vlaneseq }
  0x64   : > { %v721_v19 = vpop.eup %720 }
  0x65   : > { %v275_v22 = vmul.f32 %v274_v18, %v268_v0  ;;  %v280_v23 = vmul.f32 0.6931472, %v721_v19  ;;  %v290_v24 = vrot.slane %v289_v20, 1  ;;  %v297_v27 = vrot.slane %v296_v21, 1 }
  0x66   : > { %v358_v14 = vshrl.u32 %v357_v13, 7 }
  0x67   : > { %v281_v25 = vmul.f32 %v280_v23, %v276_v3  ;;  %v291_v26 = vadd.f32 %v290_v24, %v289_v20  ;;  %v298_v31 = vadd.f32 %v297_v27, %v296_v21 }
  0x68   : > { %vm359_vm2 = vcmp.eq.s32.totalorder %v358_v14, 0  ;;  %vm362_vm3 = vcmp.eq.s32.totalorder %v358_v14, 1  ;;  %vm366_vm4 = vcmp.eq.s32.totalorder %v358_v14, 2  ;;  %vm370_vm5 = vcmp.eq.s32.totalorder %v358_v14, 3 }
  0x69   : > { %v282_v28 = vadd.f32 %v281_v25, %v275_v22  ;;  %v317_v29 = vsel %vm316_vm1, %v291_v26, 0.0  ;;  %v327_v36 = vsel %vm316_vm1, %v298_v31, 0.0 }
  0x6a   : > { %318 = vadd.xlane.f32.xlu0 %v317_v29 }
  0x6b   : > { %v283_v30 = vsub.f32 0.0, %v282_v28 }
  0x6d   : > { %v300_v32 = vmul.f32 %v284_v8, %v283_v30  ;;  %v308_v33 = vmul.f32 %v285_v9, %v283_v30 }
  0x6f   : > { %v301_v34 = vrot.slane %v300_v32, 4  ;;  %v309_v35 = vrot.slane %v308_v33, 4 }
  0x71   : > { %v302_v37 = vadd.f32 %v301_v34, %v300_v32  ;;  %v310_v38 = vadd.f32 %v309_v35, %v308_v33 }
  0x72   : > { %328 = vadd.xlane.f32.xlu0 %v327_v36 }
  0x73   : > { %v303_v39 = vrot.slane %v302_v37, 2  ;;  %v311_v40 = vrot.slane %v310_v38, 2 }
  0x75   : > { %v304_v41 = vadd.f32 %v303_v39, %v302_v37  ;;  %v312_v42 = vadd.f32 %v311_v40, %v310_v38 }
  0x77   : > { %v305_v43 = vrot.slane %v304_v41, 1  ;;  %v313_v45 = vrot.slane %v312_v42, 1 }
  0x79   : > { %v306_v44 = vadd.f32 %v305_v43, %v304_v41  ;;  %v314_v47 = vadd.f32 %v313_v45, %v312_v42 }
  0x7b   : > { %v337_v46 = vsel %vm316_vm1, %v306_v44, 0.0  ;;  %v347_v48 = vsel %vm316_vm1, %v314_v47, 0.0 }
  0x7c   : > { %338 = vadd.xlane.f32.xlu1 %v337_v46 }
  0x84   : > { %348 = vadd.xlane.f32.xlu1 %v347_v48 }
  0xdd   : > { %v319_v49 = vpop.xlane.xlu0 %318 }
  0xde   : > { %v320_v50 = vrot.slane %v319_v49, 4 }
  0xe0   : > { %v321_v51 = vadd.f32 %v320_v50, %v319_v49 }
  0xe2   : > { %v322_v52 = vrot.slane %v321_v51, 2 }
  0xe4   : > { %v323_v53 = vadd.f32 %v322_v52, %v321_v51 }
  0xe5   : > { %v329_v54 = vpop.xlane.xlu0 %328 }
  0xe6   : > { %v330_v55 = vrot.slane %v329_v54, 4  ;;  %v324_v56 = vrot.slane %v323_v53, 1 }
  0xe8   : > { %v331_v57 = vadd.f32 %v330_v55, %v329_v54  ;;  %v325_v58 = vadd.f32 %v324_v56, %v323_v53 }
  0xea   : > { %v332_v59 = vrot.slane %v331_v57, 2  ;;  %644 = vpush %v325_v58 }
  0xec   : > { %v333_v60 = vadd.f32 %v332_v59, %v331_v57 }
  0xee   : > { %v334_v62 = vrot.slane %v333_v60, 1 }
  0xef   : > { %v339_v61 = vpop.xlane.xlu1 %338 }
  0xf0   : > { %v340_v63 = vrot.slane %v339_v61, 4  ;;  %v335_v0 = vadd.f32 %v334_v62, %v333_v60 }
  0xf2   : > { %v341_v1 = vadd.f32 %v340_v63, %v339_v61  ;;  %646 = vpush %v335_v0 }
  0xf4   : > { %v342_v2 = vrot.slane %v341_v1, 2 }
  0xf6   : > { %v343_v3 = vadd.f32 %v342_v2, %v341_v1 }
  0xf7   : > { %v349_v4 = vpop.xlane.xlu1 %348 }
  0xf8   : > { %v350_v5 = vrot.slane %v349_v4, 4  ;;  %v344_v6 = vrot.slane %v343_v3, 1 }
  0xfa   : > { %v351_v7 = vadd.f32 %v350_v5, %v349_v4  ;;  %v345_v8 = vadd.f32 %v344_v6, %v343_v3 }
  0xfc   : > { %v352_v9 = vrot.slane %v351_v7, 2  ;;  %648 = vpush %v345_v8 }
  0xfe   : > { %v353_v10 = vadd.f32 %v352_v9, %v351_v7 }
 0x100   : > { %v354_v11 = vrot.slane %v353_v10, 1 }
 0x102   : > { %v355_v12 = vadd.f32 %v354_v11, %v353_v10 }
 0x104   : > { %650 = vpush %v355_v12 }
 0x11b   : > { %s645_s22 = spop %644 }
 0x11c   : > { %v360_v15 = vstv %s645_s22 }
 0x11d   : > { %v361_v18 = vsel %vm359_vm2, %v360_v15, 0.0 }
 0x123   : > { %s647_s17 = spop %646 }
 0x124   : > { %v363_v16 = vstv %s647_s17 }
 0x125   : > { %v364_v19 = vsel %vm362_vm3, %v363_v16, 0.0 }
 0x126   : > { %v365_v21 = vadd.f32 %v364_v19, %v361_v18 }
 0x12d   : > { %s649_s8 = spop %648 }
 0x12e   : > { %v367_v17 = vstv %s649_s8 }
 0x12f   : > { %v368_v20 = vsel %vm366_vm4, %v367_v17, 0.0 }
 0x130   : > { %v369_v22 = vadd.f32 %v368_v20, %v365_v21 }
 0x135   : > { %s651_s4 = spop %650 }
 0x136   : > { %v371_v23 = vstv %s651_s4 }
 0x137   : > { %v372_v24 = vsel %vm370_vm5, %v371_v23, 0.0 }
 0x138   : > { %v373_v25 = vadd.f32 %v372_v24, %v369_v22 }
 0x13a   : > { %374 = vst [vmem:[%s1063_s25] sm:$0xff] %v373_v25 }
 0x13b PF: > { %p638_p6 = scmp.ne.s32.totalorder %s931_s16, 1 }
 0x13c   : > { %s639_s30 = sshll.u32 (!%p638_p6), %s931_s16, 3 }
 0x13d   : > { %378 = sbr.rel (%p638_p6) target bundleno = 555 (0x22b), region = 52 }
 0x142   : > { %v383_v26 = vlaneseq  ;;  %v381_v27 = vld [vmem:[%s229_s10] sm:$0xff]  ;;  %v385_v28 = vstv %s639_s30  ;;  %v380_v30 = vld [vmem:[%s219_s9] sm:$0xff]  ;;  %v889_v35 = vmov 0.0   ;;  %vm437_vm9 = vcmask 1040384  }
 0x143   : > { %vm390_vm6 = vcmp.lt.f32.partialorder %v381_v27, 0.95  ;;  %v379_v32 = vld [vmem:[%s209_s6] sm:$0xff] }
 0x144   : > { %v1081_v29 = vshrl.u32 %v383_v26, 7 }
 0x146   : > { %v386_v31 = vadd.s32 %v385_v28, %v1081_v29  ;;  %vm478_vm10 = vcmp.eq.s32.totalorder %v1081_v29, 0  ;;  %vm481_vm11 = vcmp.eq.s32.totalorder %v1081_v29, 1  ;;  %vm485_vm12 = vcmp.eq.s32.totalorder %v1081_v29, 2 }
 0x147   : > { %vm489_vm13 = vcmp.eq.s32.totalorder %v1081_v29, 3 }
 0x148   : > { %vm387_vm7 = vcmp.lt.s32.totalorder %v386_v31, 16 }
 0x149   : > { %v389_v33 = vsel %vm387_vm7, %v380_v30, 0.0  ;;  %vm391_vm8 = vmand %vm387_vm7, %vm390_vm6  ;;  %v388_v34 = vsel %vm387_vm7, %v379_v32, 0.5 }
 0x14a   : > { %v392_v36 = vsel %vm391_vm8, 1.0, %v889_v35  ;;  %v397_v37 = vsub.f32 1.0, %v389_v33  ;;  %v393_v38 = vadd.f32 1e-08, %v388_v34  ;;  %v398_v39 = vsub.f32 1.0, %v388_v34 }
 0x14b   : > { %v405_v40 = vmul.f32 %v392_v36, %v389_v33 }
 0x14c   : > { %v406_v41 = vmul.f32 %v397_v37, %v392_v36  ;;  %722 = vlog2.f32 %v393_v38  ;;  %v399_v42 = vadd.f32 1e-08, %v398_v39 }
 0x14d   : > { %v407_v43 = vrot.slane %v405_v40, 4 }
 0x14e   : > { %v414_v44 = vrot.slane %v406_v41, 4  ;;  %724 = vlog2.f32 %v399_v42 }
 0x14f   : > { %v408_v45 = vadd.f32 %v407_v43, %v405_v40 }
 0x150   : > { %v415_v46 = vadd.f32 %v414_v44, %v406_v41 }
 0x151   : > { %v409_v47 = vrot.slane %v408_v45, 2 }
 0x152   : > { %v723_v48 = vpop.eup %722  ;;  %v416_v49 = vrot.slane %v415_v46, 2 }
 0x153   : > { %v410_v50 = vadd.f32 %v409_v47, %v408_v45  ;;  %v395_v51 = vmul.f32 0.6931472, %v723_v48 }
 0x154   : > { %v725_v52 = vpop.eup %724  ;;  %v417_v53 = vadd.f32 %v416_v49, %v415_v46 }
 0x155   : > { %v411_v54 = vrot.slane %v410_v50, 1  ;;  %v396_v55 = vmul.f32 %v395_v51, %v389_v33  ;;  %v401_v56 = vmul.f32 0.6931472, %v725_v52 }
 0x156   : > { %v418_v58 = vrot.slane %v417_v53, 1 }
 0x157   : > { %v412_v57 = vadd.f32 %v411_v54, %v410_v50  ;;  %v402_v59 = vmul.f32 %v401_v56, %v397_v37 }
 0x158   : > { %v419_v62 = vadd.f32 %v418_v58, %v417_v53 }
 0x159   : > { %v438_v60 = vsel %vm437_vm9, %v412_v57, 0.0  ;;  %v403_v61 = vadd.f32 %v402_v59, %v396_v55 }
 0x15a   : > { %439 = vadd.xlane.f32.xlu0 %v438_v60  ;;  %v448_v2 = vsel %vm437_vm9, %v419_v62, 0.0 }
 0x15b   : > { %v404_v63 = vsub.f32 0.0, %v403_v61 }
 0x15d   : > { %v421_v0 = vmul.f32 %v405_v40, %v404_v63  ;;  %v429_v1 = vmul.f32 %v406_v41, %v404_v63 }
 0x15f   : > { %v422_v3 = vrot.slane %v421_v0, 4  ;;  %v430_v4 = vrot.slane %v429_v1, 4 }
 0x161   : > { %v423_v5 = vadd.f32 %v422_v3, %v421_v0  ;;  %v431_v6 = vadd.f32 %v430_v4, %v429_v1 }
 0x162   : > { %449 = vadd.xlane.f32.xlu0 %v448_v2 }
 0x163   : > { %v424_v7 = vrot.slane %v423_v5, 2  ;;  %v432_v8 = vrot.slane %v431_v6, 2 }
 0x165   : > { %v425_v9 = vadd.f32 %v424_v7, %v423_v5  ;;  %v433_v10 = vadd.f32 %v432_v8, %v431_v6 }
 0x167   : > { %v426_v11 = vrot.slane %v425_v9, 1  ;;  %v434_v13 = vrot.slane %v433_v10, 1 }
 0x169   : > { %v427_v12 = vadd.f32 %v426_v11, %v425_v9  ;;  %v435_v15 = vadd.f32 %v434_v13, %v433_v10 }
 0x16b   : > { %v458_v14 = vsel %vm437_vm9, %v427_v12, 0.0  ;;  %v468_v16 = vsel %vm437_vm9, %v435_v15, 0.0 }
 0x16c   : > { %459 = vadd.xlane.f32.xlu1 %v458_v14 }
 0x174   : > { %469 = vadd.xlane.f32.xlu1 %v468_v16 }
 0x1cd   : > { %v440_v17 = vpop.xlane.xlu0 %439 }
 0x1ce   : > { %v441_v18 = vrot.slane %v440_v17, 4 }
 0x1d0   : > { %v442_v19 = vadd.f32 %v441_v18, %v440_v17 }
 0x1d2   : > { %v443_v20 = vrot.slane %v442_v19, 2 }
 0x1d4   : > { %v444_v21 = vadd.f32 %v443_v20, %v442_v19 }
 0x1d5   : > { %v450_v22 = vpop.xlane.xlu0 %449 }
 0x1d6   : > { %v451_v23 = vrot.slane %v450_v22, 4  ;;  %v445_v24 = vrot.slane %v444_v21, 1 }
 0x1d8   : > { %v452_v25 = vadd.f32 %v451_v23, %v450_v22  ;;  %v446_v26 = vadd.f32 %v445_v24, %v444_v21 }
 0x1da   : > { %v453_v27 = vrot.slane %v452_v25, 2  ;;  %652 = vpush %v446_v26 }
 0x1dc   : > { %v454_v28 = vadd.f32 %v453_v27, %v452_v25 }
 0x1de   : > { %v455_v30 = vrot.slane %v454_v28, 1 }
 0x1df   : > { %v460_v31 = vpop.xlane.xlu1 %459 }
 0x1e0   : > { %v461_v32 = vrot.slane %v460_v31, 4  ;;  %v456_v33 = vadd.f32 %v455_v30, %v454_v28 }
 0x1e2   : > { %v462_v34 = vadd.f32 %v461_v32, %v460_v31  ;;  %654 = vpush %v456_v33 }
 0x1e4   : > { %v463_v35 = vrot.slane %v462_v34, 2 }
 0x1e6   : > { %v464_v36 = vadd.f32 %v463_v35, %v462_v34 }
 0x1e7   : > { %v470_v37 = vpop.xlane.xlu1 %469 }
 0x1e8   : > { %v471_v38 = vrot.slane %v470_v37, 4  ;;  %v465_v39 = vrot.slane %v464_v36, 1 }
 0x1ea   : > { %v472_v40 = vadd.f32 %v471_v38, %v470_v37  ;;  %v466_v41 = vadd.f32 %v465_v39, %v464_v36 }
 0x1ec   : > { %v473_v42 = vrot.slane %v472_v40, 2  ;;  %656 = vpush %v466_v41 }
 0x1ee   : > { %v474_v43 = vadd.f32 %v473_v42, %v472_v40 }
 0x1f0   : > { %v475_v44 = vrot.slane %v474_v43, 1 }
 0x1f2   : > { %v476_v45 = vadd.f32 %v475_v44, %v474_v43 }
 0x1f4   : > { %658 = vpush %v476_v45 }
 0x20b   : > { %s653_s7 = spop %652 }
 0x20c   : > { %v479_v46 = vstv %s653_s7 }
 0x20d   : > { %v480_v49 = vsel %vm478_vm10, %v479_v46, 0.0 }
 0x213   : > { %s655_s29 = spop %654 }
 0x214   : > { %v482_v47 = vstv %s655_s29 }
 0x215   : > { %v483_v50 = vsel %vm481_vm11, %v482_v47, 0.0 }
 0x216   : > { %v484_v52 = vadd.f32 %v483_v50, %v480_v49 }
 0x21d   : > { %s657_s5 = spop %656 }
 0x21e   : > { %v486_v48 = vstv %s657_s5 }
 0x21f   : > { %v487_v51 = vsel %vm485_vm12, %v486_v48, 0.0 }
 0x220   : > { %v488_v53 = vadd.f32 %v487_v51, %v484_v52 }
 0x225   : > { %s659_s11 = spop %658 }
 0x226   : > { %v490_v54 = vstv %s659_s11 }
 0x227   : > { %v491_v55 = vsel %vm489_vm13, %v490_v54, 0.0 }
 0x228   : > { %v492_v56 = vadd.f32 %v491_v55, %v488_v53 }
 0x22a   : > { %493 = vst [vmem:[%s1063_s25] sm:$0xff] %v492_v56 }
 0x22b PF: > { %s641_s19 = sshll.u32 %s931_s16, 3  ;;  %s507_s6 = sshll.u32 %s1063_s25, 4  ;;  %s508_s6 = int_to_ptr.vmem [resolvable:$true] %s507_s6 }
 0x22c   : > { %s505_s27 = scalar_lea.hbm %s1134_s3, %s641_s19  ;;  %s495_s28 = scalar_lea.sflag [#allocation4], %s1044_s1 }
 0x22d   : > { %s509_s21 = sshll.u32 %s505_s27, 4  ;;  %s836_s16 = scalar_lea.hbm %s1134_s3, 16  ;;  %s510_s21 = int_to_ptr.hbm [resolvable:$true] %s509_s21 }
 0x22e   : > { %s830_s9 = sshra.s32 %s510_s21, 4  ;;  %s831_s9 = int_to_ptr.hbm [resolvable:$true] %s830_s9 }
 0x22f   : > { %s832_s10 = scalar_lea.hbm %s831_s9, 8  ;;  %p837_p5 = scmp.lt.s32.totalorder %s831_s9, %s1134_s3 }
 0x230   : > { %p833_p2 = scmp.ne.s32.totalorder %s831_s9, %s832_s10  ;;  %p838_p7 = scmp.lt.s32.totalorder %s836_s16, %s832_s10 }
 0x232   : > { %p834_p3 = pnand %p833_p2, %p956_p11  ;;  %p839_p0 = por %p838_p7, %p837_p5 }
 0x234   : > { %p835_p4 = pneg %p834_p3 }
 0x236   : > { %p840_p8 = pnand %p839_p0, %p835_p4 }
 0x238   : > { %843 = shalt.err (!%p840_p8)
}
 0x239   : > { %666 = dma.vmem_to_hbm [thread:$0]  (%p956_p11), %s508_s6, 128, %s510_s21, %s495_s28  }
 0x23a PF: > { %s521_s1 = sand.u32 1, %s874_s12   ;;  %p679_p10 = pnand %p625_p9, %p960_p12 }
 0x23b   : > { %s522_s25 = scalar_lea.sflag [#allocation4], %s521_s1 }
 0x23c   : > { %p680_p1 = pneg %p679_p10 }
 0x23e   : > { %869 = dma.done.wait (%p680_p1), %s522_s25, 128  }
 0x23f   : > { %871 = vsyncadd (%p680_p1), %s522_s25, 4294967168  ;;  %s1143_s30 = sld [smem:[#allocation12_spill]]  ;;  %p19_p13 = scmp.ge.s32.totalorder %s935_s18, 4  }
 0x240   : > { %s1144_s12 = smov %s878_s13  ;;  %s1145_s13 = smov %s882_s14 }
 0x241   : > { %s1147_s15 = smov %s935_s18  ;;  %21 = sbr.rel (!%p19_p13) target bundleno = 9 (0x9), region = 109 }
 0x245   : > { %s1146_s14 = smov %s1143_s30 }
 0x246   :  { %528 = vsyncpa [#allocation3], 1 }
 0x247   :  { %530 = vsyncpa [#allocation3 + $0x1], 1 }
 0x248   :  { %531 = vsyncpa [#allocation6], 1 }
 0x249   :  { %533 = vsyncpa [#allocation6 + $0x1], 1 }
 0x24a   :  { %534 = vsyncpa [#allocation4], 1 }
 0x24b   :  { %536 = vsyncpa [#allocation4 + $0x1], 1 }

</bundles_post_ra>
